<compile_context>
chip_gen: v5e
topology: v5e:2x2
jax: 0.10.0
libtpu: 0.0.40
codegen_flags: <defaults>
</compile_context>

<pallas_src>
import jax
import jax.numpy as jnp
from jax.experimental import pallas as pl
from jax.experimental.pallas import tpu as pltpu


def _round_up(n, m):
    return ((n + m - 1) // m) * m


def _pad_to(a, shape):
    pads = tuple((0, t - s) for s, t in zip(a.shape, shape))
    if all(p == (0, 0) for p in pads):
        return a
    return jnp.pad(a, pads)


def _pick_batch_tiling(batch, block_b):
    """Choose (tile, padded_batch). Tile is the lane width of each grid step."""
    if batch <= 1024:
        # Small batch: a single lane-aligned tile (can't usefully feed 2 cores).
        tb = _round_up(batch, 128)
        return tb, tb
    # Prefer >= 2 grid steps (v7x megacore), tiles capped ~block_b, lane width
    # a multiple of 512, padding bounded by (less than) one tile.
    n_steps = max(2, pl.cdiv(batch, block_b))
    tb = _round_up(pl.cdiv(batch, n_steps), 512)
    b_pad = _round_up(batch, tb)
    return tb, b_pad


# ----------------------------- kernels ------------------------------------ #
# All operands are transposed: batch lives on the lane (last) axis.
#   xt   : (in_pad, tb)      w1t : (hid_p, in_pad)    b1 : (hid_p, 1)
#   w2t  : (hid_p, hid_p)    b2  : (hid_p, 1)
#   w3t  : (out_dims, hid_p) b3  : SMEM scalar (out_dims==1) or (out_dims, 1)
#   out  : (out_dims, tb)    -- lane-dense store.
def _mlp_body_t(xt_ref, w1t_ref, b1_ref, w2t_ref, b2_ref, w3t_ref):
    # layer 1: MXU matmul (f32 accumulation) + bias + relu (VPU)
    h = jnp.dot(w1t_ref[...], xt_ref[...], preferred_element_type=jnp.float32)
    h = jnp.maximum(h + b1_ref[...], 0.0)
    # layer 2 (h kept in f32; weight promoted -- compute is not the bottleneck)
    h = jnp.dot(w2t_ref[...], h, preferred_element_type=jnp.float32)
    h = jnp.maximum(h + b2_ref[...], 0.0)
    # output layer (bias added by the caller-specific kernel)
    return jnp.dot(w3t_ref[...], h, preferred_element_type=jnp.float32)


def _mlp_kernel_smem_bias(xt_ref, w1t_ref, b1_ref, w2t_ref, b2_ref, w3t_ref,
                          b3_ref, o_ref):
    out = _mlp_body_t(xt_ref, w1t_ref, b1_ref, w2t_ref, b2_ref, w3t_ref)
    o_ref[...] = out + b3_ref[0, 0]          # scalar output bias from SMEM


def _mlp_kernel_vmem_bias(xt_ref, w1t_ref, b1_ref, w2t_ref, b2_ref, w3t_ref,
                          b3_ref, o_ref):
    out = _mlp_body_t(xt_ref, w1t_ref, b1_ref, w2t_ref, b2_ref, w3t_ref)
    o_ref[...] = out + b3_ref[...]           # (out_dims, 1) column bias


# ----------------------------- wrapper ------------------------------------ #
def mlp_forward(x, w1, b1, w2, b2, w3, b3, *, block_b=8192,
                compute_dtype=jnp.bfloat16):
    """x: [B, input_dims]; returns [B] when output_dims == 1 (matching the
    PyTorch out.squeeze(1)), otherwise [B, output_dims]."""
    B, in_dims = x.shape
    out_dims = w3.shape[1]

    # --- pad feature / hidden dims to native vreg tiling (zero pad -> exact) -
    sub_pack = 8 * (4 // jnp.dtype(compute_dtype).itemsize)   # 8 f32 / 16 bf16
    in_pad = _round_up(in_dims, sub_pack)
    hid_p = _round_up(w1.shape[1], 128)

    w1t_p = _pad_to(w1.T.astype(compute_dtype), (hid_p, in_pad))
    b1_p = _pad_to(b1.astype(jnp.float32).reshape(-1, 1), (hid_p, 1))
    w2t_p = _pad_to(w2.T.astype(compute_dtype), (hid_p, hid_p))
    b2_p = _pad_to(b2.astype(jnp.float32).reshape(-1, 1), (hid_p, 1))
    w3t_p = _pad_to(w3.T.astype(compute_dtype), (out_dims, hid_p))

    # --- batch tiling: batch on the lane axis, large tiles, bounded padding --
    tb, b_pad = _pick_batch_tiling(B, block_b)
    xt_p = _pad_to(x.astype(compute_dtype).T, (in_pad, b_pad))

    def resident(shape):  # weights/biases: same block for every grid step
        return pl.BlockSpec(shape, lambda i: (0, 0))

    if out_dims == 1:
        kernel = _mlp_kernel_smem_bias
        b3_p = b3.reshape(1, 1).astype(jnp.float32)
        b3_spec = pl.BlockSpec(memory_space=pltpu.MemorySpace.SMEM)
    else:
        kernel = _mlp_kernel_vmem_bias
        b3_p = b3.reshape(-1, 1).astype(jnp.float32)
        b3_spec = resident((out_dims, 1))

    out = pl.pallas_call(
        kernel,
        out_shape=jax.ShapeDtypeStruct((out_dims, b_pad), jnp.float32),
        grid=(b_pad // tb,),
        in_specs=[
            pl.BlockSpec((in_pad, tb), lambda i: (0, i)),   # x^T: tiled (lanes)
            resident((hid_p, in_pad)),                      # W1^T (VMEM-resident)
            resident((hid_p, 1)),                           # b1
            resident((hid_p, hid_p)),                       # W2^T
            resident((hid_p, 1)),                           # b2
            resident((out_dims, hid_p)),                    # W3^T
            b3_spec,                                        # b3
        ],
        out_specs=pl.BlockSpec((out_dims, tb), lambda i: (0, i)),  # lane-dense
        compiler_params=pltpu.CompilerParams(
            dimension_semantics=("parallel",),              # megacore on v7x
            vmem_limit_bytes=32 * 1024 * 1024),             # explicit budget
    )(xt_p, w1t_p, b1_p, w2t_p, b2_p, w3t_p, b3_p)

    if out_dims == 1:
        return out[0, :B]            # torch .squeeze(1): drop size-1 dim 1
    return out[:, :B].T


def init_params(key, input_dims, hidden_dims, output_dims):
    """Deterministic synthetic parameters (uniform, nn.Linear-like init scale)."""
    ks = jax.random.split(key, 6)

    def lin(kw, kb, fan_in, fan_out):
        bound = 1.0 / jnp.sqrt(fan_in)
        w = jax.random.uniform(kw, (fan_in, fan_out), jnp.float32, -bound, bound)
        b = jax.random.uniform(kb, (fan_out,), jnp.float32, -bound, bound)
        return w, b

    w1, b1 = lin(ks[0], ks[1], input_dims, hidden_dims)
    w2, b2 = lin(ks[2], ks[3], hidden_dims, hidden_dims)
    w3, b3 = lin(ks[4], ks[5], hidden_dims, output_dims)
    return w1, b1, w2, b2, w3, b3


def _reference(x, w1, b1, w2, b2, w3, b3):
    h = jnp.maximum(x @ w1 + b1, 0.0)
    h = jnp.maximum(h @ w2 + b2, 0.0)
    return (h @ w3 + b3)[:, 0]


if __name__ == "__main__":
    # Auto-MPG-like shapes: 7 input features, hidden=32, scalar regression target.
    input_dims, hidden_dims, output_dims = 7, 32, 1
    key = jax.random.PRNGKey(0)
    kx, kp, kx2 = jax.random.split(key, 3)
    params = init_params(kp, input_dims, hidden_dims, output_dims)

    # --- small batch (single grid step) -------------------------------------
    B = 8
    x = jax.random.normal(kx, (B, input_dims), dtype=jnp.float32)
    ref = _reference(x, *params)

    out_f32 = mlp_forward(x, *params, compute_dtype=jnp.float32)  # tight check
    jax.block_until_ready(out_f32)
    assert out_f32.shape == (B,)
    assert jnp.allclose(out_f32, ref, atol=1e-3, rtol=1e-3)

    out_bf16 = mlp_forward(x, *params)                            # default path
    jax.block_until_ready(out_bf16)
    assert out_bf16.shape == (B,)
    assert jnp.allclose(out_bf16, ref, atol=1e-1, rtol=1e-1)

    # --- larger batch: exercises the multi-step, padded, "parallel" grid -----
    B2 = 1500
    x2 = jax.random.normal(kx2, (B2, input_dims), dtype=jnp.float32)
    ref2 = _reference(x2, *params)
    out2 = mlp_forward(x2, *params, compute_dtype=jnp.float32)
    jax.block_until_ready(out2)
    assert out2.shape == (B2,)
    assert jnp.allclose(out2, ref2, atol=1e-3, rtol=1e-3)

    print("KERNEL_OK")
</pallas_src>

<mosaic_0001>
module attributes {stable_mosaic.version = 11 : i64} {
  func.func @_mlp_kernel_smem_bias(%arg0: i32, %arg1: memref<8x128xf32, #tpu.memory_space<vmem>>, %arg2: memref<128x8xf32, #tpu.memory_space<vmem>>, %arg3: memref<128x1xf32, #tpu.memory_space<vmem>>, %arg4: memref<128x128xf32, #tpu.memory_space<vmem>>, %arg5: memref<128x1xf32, #tpu.memory_space<vmem>>, %arg6: memref<1x128xf32, #tpu.memory_space<vmem>>, %arg7: memref<1x1xf32, #tpu.memory_space<smem>>, %arg8: memref<1x128xf32, #tpu.memory_space<vmem>>) attributes {dimension_semantics = [#tpu.dimension_semantics<parallel>], iteration_bounds = array<i64: 1>, scalar_prefetch = 0 : i64, scratch_operands = 0 : i64, tpu.core_type = #tpu.core_type<tc>, window_params = [{transform_indices = @transform_0, window_bounds = array<i64: 8, 128>}, {pipeline_mode = #tpu.pipeline_mode<synchronous>, transform_indices = @transform_1, window_bounds = array<i64: 128, 8>}, {pipeline_mode = #tpu.pipeline_mode<synchronous>, transform_indices = @transform_2, window_bounds = array<i64: 128, 1>}, {pipeline_mode = #tpu.pipeline_mode<synchronous>, transform_indices = @transform_3, window_bounds = array<i64: 128, 128>}, {pipeline_mode = #tpu.pipeline_mode<synchronous>, transform_indices = @transform_4, window_bounds = array<i64: 128, 1>}, {pipeline_mode = #tpu.pipeline_mode<synchronous>, transform_indices = @transform_5, window_bounds = array<i64: 1, 128>}, {transform_indices = @transform_6, window_bounds = array<i64: 1, 1>}, {transform_indices = @transform_7, window_bounds = array<i64: 1, 128>}]} {
    %c0 = arith.constant 0 : index
    %c0_0 = arith.constant 0 : index
    %0 = vector.load %arg2[%c0, %c0_0] : memref<128x8xf32, #tpu.memory_space<vmem>>, vector<128x8xf32>
    %c0_1 = arith.constant 0 : index
    %c0_2 = arith.constant 0 : index
    %1 = vector.load %arg1[%c0_1, %c0_2] : memref<8x128xf32, #tpu.memory_space<vmem>>, vector<8x128xf32>
    %cst = arith.constant dense<0.000000e+00> : vector<128x128xf32>
    %2 = tpu.matmul %0, %1, %cst {dimension_numbers = #tpu.dot_dimension_numbers<[1], [0], [0], [1], [0, 0, 1, 1], [], []>} : vector<128x8xf32>, vector<8x128xf32>, vector<128x128xf32> -> vector<128x128xf32>
    %c0_3 = arith.constant 0 : index
    %c0_4 = arith.constant 0 : index
    %3 = vector.load %arg3[%c0_3, %c0_4] : memref<128x1xf32, #tpu.memory_space<vmem>>, vector<128x1xf32>
    %4 = vector.broadcast %3 : vector<128x1xf32> to vector<128x128xf32>
    %5 = arith.addf %2, %4 : vector<128x128xf32>
    %cst_5 = arith.constant 0.000000e+00 : f32
    %6 = vector.broadcast %cst_5 : f32 to vector<128x128xf32>
    %7 = arith.maximumf %5, %6 : vector<128x128xf32>
    %c0_6 = arith.constant 0 : index
    %c0_7 = arith.constant 0 : index
    %8 = vector.load %arg4[%c0_6, %c0_7] : memref<128x128xf32, #tpu.memory_space<vmem>>, vector<128x128xf32>
    %cst_8 = arith.constant dense<0.000000e+00> : vector<128x128xf32>
    %9 = tpu.matmul %8, %7, %cst_8 {dimension_numbers = #tpu.dot_dimension_numbers<[1], [0], [0], [1], [0, 0, 1, 1], [], []>} : vector<128x128xf32>, vector<128x128xf32>, vector<128x128xf32> -> vector<128x128xf32>
    %c0_9 = arith.constant 0 : index
    %c0_10 = arith.constant 0 : index
    %10 = vector.load %arg5[%c0_9, %c0_10] : memref<128x1xf32, #tpu.memory_space<vmem>>, vector<128x1xf32>
    %11 = vector.broadcast %10 : vector<128x1xf32> to vector<128x128xf32>
    %12 = arith.addf %9, %11 : vector<128x128xf32>
    %cst_11 = arith.constant 0.000000e+00 : f32
    %13 = vector.broadcast %cst_11 : f32 to vector<128x128xf32>
    %14 = arith.maximumf %12, %13 : vector<128x128xf32>
    %c0_12 = arith.constant 0 : index
    %c0_13 = arith.constant 0 : index
    %15 = vector.load %arg6[%c0_12, %c0_13] : memref<1x128xf32, #tpu.memory_space<vmem>>, vector<1x128xf32>
    %cst_14 = arith.constant dense<0.000000e+00> : vector<1x128xf32>
    %16 = tpu.matmul %15, %14, %cst_14 {dimension_numbers = #tpu.dot_dimension_numbers<[1], [0], [0], [1], [0, 0, 1, 1], [], []>} : vector<1x128xf32>, vector<128x128xf32>, vector<1x128xf32> -> vector<1x128xf32>
    %c0_15 = arith.constant 0 : index
    %c0_16 = arith.constant 0 : index
    %17 = memref.load %arg7[%c0_15, %c0_16] : memref<1x1xf32, #tpu.memory_space<smem>>
    %18 = vector.broadcast %17 : f32 to vector<1x128xf32>
    %19 = arith.addf %16, %18 : vector<1x128xf32>
    %c0_17 = arith.constant 0 : index
    %c0_18 = arith.constant 0 : index
    %20 = vector.load %arg8[%c0_17, %c0_18] : memref<1x128xf32, #tpu.memory_space<vmem>>, vector<1x128xf32>
    tpu.vector_store %arg8[%c0_17, %c0_18], %19 {strides = array<i32>} : memref<1x128xf32, #tpu.memory_space<vmem>>, vector<1x128xf32>,
    return
  }
  func.func @transform_0(%arg0: i32) -> (i32, i32) {
    %c0_i32 = arith.constant 0 : i32
    %c0_i32_0 = arith.constant 0 : i32
    return %c0_i32, %arg0 : i32, i32
  }
  func.func @transform_1(%arg0: i32) -> (i32, i32) {
    %c0_i32 = arith.constant 0 : i32
    %c0_i32_0 = arith.constant 0 : i32
    %c0_i32_1 = arith.constant 0 : i32
    return %c0_i32, %c0_i32_0 : i32, i32
  }
  func.func @transform_2(%arg0: i32) -> (i32, i32) {
    %c0_i32 = arith.constant 0 : i32
    %c0_i32_0 = arith.constant 0 : i32
    %c0_i32_1 = arith.constant 0 : i32
    return %c0_i32, %c0_i32_0 : i32, i32
  }
  func.func @transform_3(%arg0: i32) -> (i32, i32) {
    %c0_i32 = arith.constant 0 : i32
    %c0_i32_0 = arith.constant 0 : i32
    %c0_i32_1 = arith.constant 0 : i32
    return %c0_i32, %c0_i32_0 : i32, i32
  }
  func.func @transform_4(%arg0: i32) -> (i32, i32) {
    %c0_i32 = arith.constant 0 : i32
    %c0_i32_0 = arith.constant 0 : i32
    %c0_i32_1 = arith.constant 0 : i32
    return %c0_i32, %c0_i32_0 : i32, i32
  }
  func.func @transform_5(%arg0: i32) -> (i32, i32) {
    %c0_i32 = arith.constant 0 : i32
    %c0_i32_0 = arith.constant 0 : i32
    %c0_i32_1 = arith.constant 0 : i32
    return %c0_i32, %c0_i32_0 : i32, i32
  }
  func.func @transform_6(%arg0: i32) -> (i32, i32) {
    %c0_i32 = arith.constant 0 : i32
    %c0_i32_0 = arith.constant 0 : i32
    %c0_i32_1 = arith.constant 0 : i32
    return %c0_i32, %c0_i32_0 : i32, i32
  }
  func.func @transform_7(%arg0: i32) -> (i32, i32) {
    %c0_i32 = arith.constant 0 : i32
    %c0_i32_0 = arith.constant 0 : i32
    return %c0_i32, %arg0 : i32, i32
  }
}

</mosaic_0001>

<bundles_post_ra>
// kernel: tpu_custom_call.1
= control target key start
LH: loop header
LB: loop body
LE: loop exit
PB: predicated region body
PF: predicated region fallthrough
CT: control target
= control target key end

     0   :  { %v568_v3 = vmov 0   ;;  %vm141_vm0 = vcmask 64512   ;;  %s848_s0 = inlined_call_operand.vmem [shape: f32[8,128], index: 0, kind: input, shape index: {}]   ;;  %s849_s1 = inlined_call_operand.vmem [shape: f32[128,8], index: 1, kind: input, shape index: {}]   ;;  %s850_s2 = inlined_call_operand.vmem [shape: f32[128,1], index: 2, kind: input, shape index: {}]   ;;  %s851_s3 = inlined_call_operand.vmem [shape: f32[128,128], index: 3, kind: input, shape index: {}]   ;;  %s852_s4 = inlined_call_operand.vmem [shape: f32[128,1], index: 4, kind: input, shape index: {}]   ;;  %s853_s5 = inlined_call_operand.vmem [shape: f32[1,128], index: 5, kind: input, shape index: {}]   ;;  %s854_s6 = inlined_call_operand.<no memory space> [shape: f32[1,1], index: 6, kind: input, shape index: {}]   ;;  %s855_s7 = inlined_call_operand.hbm [shape: f32[1,128], index: 7, kind: output, shape index: {}]  }
   0x1   :  { %v44_v0 = vld [vmem:[%s848_s0] sm:$0xff]  ;;  %v60_v1 = vld [vmem:[%s850_s2 + $0x78] sm:$0xff]  ;;  %v58_v2 = vld [vmem:[%s850_s2 + $0x68] sm:$0xff]  ;;  %540 = vset.pattern.permute.xlu1 %v568_v3  ;;  %539 = vset.pattern.permute.xlu0 %v568_v3 }
   0x2   :  { %v28_v4 = vld [vmem:[%s849_s1] sm:$0xff]  ;;  %v39_v5 = vld [vmem:[%s849_s1 + $0x58] sm:$0xff]  ;;  %205 = vmatpush.msra.mxu0 %v44_v0  ;;  %520 = vmatpush.msra.mxu2 %v44_v0  ;;  %v59_v7 = vld [vmem:[%s850_s2 + $0x70] sm:$0xff] }
   0x3   :  { %138 = vperm.xlu0 %539, %v60_v1   ;;  %128 = vperm.xlu1 %540, %v58_v2   ;;  %v56_v6 = vld [vmem:[%s850_s2 + $0x58] sm:$0xff]  ;;  %v57_v8 = vld [vmem:[%s850_s2 + $0x60] sm:$0xff] }
   0x4   :  { %504 = vmatmul.msk.f32.vlgmr.msra.gmra.mxu0 %vm141_vm0, %v28_v4  ;;  %515 = vmatmul.msk.f32.vlgmr.msra.gmra.mxu2 %vm141_vm0, %v39_v5 }
   0x5   :  { %541 = vset.pattern.permute.xlu2 %v568_v3 }
   0x6   :  { %118 = vperm.xlu2 %541, %v56_v6  }
   0x7   :  { %13 = vsyncpa [#allocation4], 0  ;;  %v29_v9 = vld [vmem:[%s849_s1 + $0x8] sm:$0xff]  ;;  %v40_v10 = vld [vmem:[%s849_s1 + $0x60] sm:$0xff]  ;;  %s569_s30 = smov [#allocation3]   ;;  %s495_s0 = sshll.u32 %s855_s7, 4  ;;  %s496_s0 = int_to_ptr.hbm [resolvable:$true] %s495_s0 }
   0x8   :  { %v55_v11 = vld [vmem:[%s850_s2 + $0x50] sm:$0xff]  ;;  %v54_v12 = vld [vmem:[%s850_s2 + $0x48] sm:$0xff]  ;;  %v53_v13 = vld [vmem:[%s850_s2 + $0x40] sm:$0xff]  ;;  %s493_s8 = sshll.u32 %s569_s30, 4  ;;  %s494_s8 = int_to_ptr.vmem [resolvable:$true] %s493_s8 }
   0x9   :  { %v30_v14 = vld [vmem:[%s849_s1 + $0x10] sm:$0xff]  ;;  %v41_v15 = vld [vmem:[%s849_s1 + $0x68] sm:$0xff]  ;;  %v52_v16 = vld [vmem:[%s850_s2 + $0x38] sm:$0xff] }
   0xa   :  { %v51_v17 = vld [vmem:[%s850_s2 + $0x30] sm:$0xff]  ;;  %v50_v18 = vld [vmem:[%s850_s2 + $0x28] sm:$0xff]  ;;  %v31_v19 = vld [vmem:[%s849_s1 + $0x18] sm:$0xff] }
   0xb   :  { %133 = vperm.xlu0 %539, %v59_v7   ;;  %123 = vperm.xlu1 %540, %v57_v8   ;;  %v42_v20 = vld [vmem:[%s849_s1 + $0x70] sm:$0xff]  ;;  %v49_v21 = vld [vmem:[%s850_s2 + $0x20] sm:$0xff]  ;;  %v48_v22 = vld [vmem:[%s850_s2 + $0x18] sm:$0xff] }
   0xc   :  { %505 = vmatmul.msk.f32.gmra.mxu0 %vm141_vm0, %v29_v9  ;;  %516 = vmatmul.msk.f32.gmra.mxu2 %vm141_vm0, %v40_v10  ;;  %v47_v23 = vld [vmem:[%s850_s2 + $0x10] sm:$0xff]  ;;  %v32_v24 = vld [vmem:[%s849_s1 + $0x20] sm:$0xff]  ;;  %v43_v25 = vld [vmem:[%s849_s1 + $0x78] sm:$0xff] }
   0xd   :  { %v46_v26 = vld [vmem:[%s850_s2 + $0x8] sm:$0xff]  ;;  %v302_v27 = vld [vmem:[%s852_s4 + $0x78] sm:$0xff]  ;;  %v45_v28 = vld [vmem:[%s850_s2] sm:$0xff] }
   0xe   :  { %113 = vperm.xlu2 %541, %v55_v11   ;;  %v33_v29 = vld [vmem:[%s849_s1 + $0x28] sm:$0xff]  ;;  %v301_v30 = vld [vmem:[%s852_s4 + $0x70] sm:$0xff]  ;;  %v299_v31 = vld [vmem:[%s852_s4 + $0x60] sm:$0xff] }
   0xf   :  { %v300_v32 = vld [vmem:[%s852_s4 + $0x68] sm:$0xff]  ;;  %v34_v33 = vld [vmem:[%s849_s1 + $0x30] sm:$0xff]  ;;  %v298_v34 = vld [vmem:[%s852_s4 + $0x58] sm:$0xff] }
  0x10   :  { %v296_v35 = vld [vmem:[%s852_s4 + $0x48] sm:$0xff]  ;;  %v297_v36 = vld [vmem:[%s852_s4 + $0x50] sm:$0xff]  ;;  %v35_v37 = vld [vmem:[%s849_s1 + $0x38] sm:$0xff] }
  0x11   :  { %v295_v38 = vld [vmem:[%s852_s4 + $0x40] sm:$0xff]  ;;  %v293_v39 = vld [vmem:[%s852_s4 + $0x30] sm:$0xff]  ;;  %v294_v40 = vld [vmem:[%s852_s4 + $0x38] sm:$0xff] }
  0x12   :  { %v36_v41 = vld [vmem:[%s849_s1 + $0x40] sm:$0xff]  ;;  %v292_v42 = vld [vmem:[%s852_s4 + $0x28] sm:$0xff]  ;;  %v290_v43 = vld [vmem:[%s852_s4 + $0x18] sm:$0xff] }
  0x13   :  { %108 = vperm.xlu0 %539, %v54_v12   ;;  %103 = vperm.xlu1 %540, %v53_v13   ;;  %v291_v44 = vld [vmem:[%s852_s4 + $0x20] sm:$0xff]  ;;  %v37_v45 = vld [vmem:[%s849_s1 + $0x48] sm:$0xff]  ;;  %v289_v46 = vld [vmem:[%s852_s4 + $0x10] sm:$0xff] }
  0x14   :  { %506 = vmatmul.msk.f32.gmra.mxu0 %vm141_vm0, %v30_v14  ;;  %517 = vmatmul.msk.f32.gmra.mxu2 %vm141_vm0, %v41_v15  ;;  %v287_v47 = vld [vmem:[%s852_s4] sm:$0xff]  ;;  %v288_v48 = vld [vmem:[%s852_s4 + $0x8] sm:$0xff]  ;;  %v38_v49 = vld [vmem:[%s849_s1 + $0x50] sm:$0xff] }
  0x16   :  { %98 = vperm.xlu2 %541, %v52_v16  }
  0x1b   :  { %93 = vperm.xlu0 %539, %v51_v17   ;;  %88 = vperm.xlu1 %540, %v50_v18  }
  0x1c   :  { %507 = vmatmul.msk.f32.gmra.mxu0 %vm141_vm0, %v31_v19  ;;  %518 = vmatmul.msk.f32.gmra.mxu2 %vm141_vm0, %v42_v20 }
  0x1e   :  { %83 = vperm.xlu2 %541, %v49_v21  }
  0x23   :  { %78 = vperm.xlu0 %539, %v48_v22   ;;  %73 = vperm.xlu1 %540, %v47_v23  }
  0x24   :  { %508 = vmatmul.msk.f32.gmra.mxu0 %vm141_vm0, %v32_v24  ;;  %519 = vmatmul.msk.f32.gmra.mxu2 %vm141_vm0, %v43_v25 }
  0x26   :  { %68 = vperm.xlu2 %541, %v46_v26  }
  0x2b   :  { %380 = vperm.xlu1 %540, %v302_v27   ;;  %63 = vperm.xlu0 %539, %v45_v28  }
  0x2c   :  { %509 = vmatmul.msk.f32.gmra.mxu0 %vm141_vm0, %v33_v29 }
  0x2e   :  { %375 = vperm.xlu2 %541, %v301_v30  }
  0x33   :  { %365 = vperm.xlu1 %540, %v299_v31   ;;  %370 = vperm.xlu0 %539, %v300_v32  }
  0x34   :  { %510 = vmatmul.msk.f32.gmra.mxu0 %vm141_vm0, %v34_v33 }
  0x36   :  { %360 = vperm.xlu2 %541, %v298_v34  }
  0x3b   :  { %350 = vperm.xlu1 %540, %v296_v35   ;;  %355 = vperm.xlu0 %539, %v297_v36  }
  0x3c   :  { %511 = vmatmul.msk.f32.gmra.mxu0 %vm141_vm0, %v35_v37 }
  0x3e   :  { %345 = vperm.xlu2 %541, %v295_v38  }
  0x43   :  { %335 = vperm.xlu1 %540, %v293_v39   ;;  %340 = vperm.xlu0 %539, %v294_v40  }
  0x44   :  { %512 = vmatmul.msk.f32.gmra.mxu0 %vm141_vm0, %v36_v41 }
  0x46   :  { %330 = vperm.xlu2 %541, %v292_v42  }
  0x4b   :  { %320 = vperm.xlu1 %540, %v290_v43   ;;  %325 = vperm.xlu0 %539, %v291_v44  }
  0x4c   :  { %513 = vmatmul.msk.f32.gmra.mxu0 %vm141_vm0, %v37_v45 }
  0x4e   :  { %315 = vperm.xlu2 %541, %v289_v46  }
  0x53   :  { %305 = vperm.xlu1 %540, %v287_v47   ;;  %310 = vperm.xlu0 %539, %v288_v48  }
  0x54   :  { %514 = vmatmul.msk.f32.gmra.mxu0 %vm141_vm0, %v38_v49 }
  0x60   :  { %v119_v8 = vpop.permute.xlu2 %118 }
  0x68   :  { %v114_v14 = vpop.permute.xlu2 %113 }
  0x70   :  { %v99_v19 = vpop.permute.xlu2 %98 }
  0x75   :  { %v139_v57 = vpop.permute.xlu0 %138  ;;  %v129_v58 = vpop.permute.xlu1 %128 }
  0x78   :  { %v84_v27 = vpop.permute.xlu2 %83 }
  0x7d   :  { %v134_v61 = vpop.permute.xlu0 %133  ;;  %v124_v2 = vpop.permute.xlu1 %123 }
  0x80   :  { %v69_v40 = vpop.permute.xlu2 %68 }
  0x81   :  { %v773_v50 = vpop.f32.mrf.mxu0 }
  0x85   :  { %v109_v16 = vpop.permute.xlu0 %108  ;;  %v104_v17 = vpop.permute.xlu1 %103 }
  0x87   :  { %v240_v51 = vpop.f32.mrf.mxu2 }
  0x88   :  { %v241_v9 = vadd.f32 %v240_v51, %v119_v8  ;;  %v271_v51 = vld [vmem:[%s851_s3] sm:$0xff] }
  0x89   :  { %v775_v52 = vpop.f32.mrf.mxu0 }
  0x8a   :  { %v266_v12 = vmax.f32 %v241_v9, 0.0  ;;  %v211_v44 = vadd.f32 %v775_v52, %v69_v40  ;;  %v279_v52 = vld [vmem:[%s851_s3 + $0x40] sm:$0xff] }
  0x8c   :  { %v256_v48 = vmax.f32 %v211_v44, 0.0 }
  0x8d   :  { %v94_v20 = vpop.permute.xlu0 %93  ;;  %v89_v24 = vpop.permute.xlu1 %88 }
  0x8f   :  { %v243_v53 = vpop.f32.mrf.mxu2 }
  0x90   :  { %v244_v4 = vadd.f32 %v243_v53, %v124_v2  ;;  %v280_v53 = vld [vmem:[%s851_s3 + $0x48] sm:$0xff] }
  0x91   :  { %v777_v54 = vpop.f32.mrf.mxu0 }
  0x92   :  { %v267_v10 = vmax.f32 %v244_v4, 0.0 }
  0x95   :  { %v79_v30 = vpop.permute.xlu0 %78  ;;  %v74_v37 = vpop.permute.xlu1 %73 }
  0x96   :  { %v214_v41 = vadd.f32 %v777_v54, %v74_v37  ;;  %v273_v54 = vld [vmem:[%s851_s3 + $0x10] sm:$0xff] }
  0x97   :  { %v246_v55 = vpop.f32.mrf.mxu2 }
  0x98   :  { %v247_v0 = vadd.f32 %v246_v55, %v129_v58  ;;  %v257_v46 = vmax.f32 %v214_v41, 0.0  ;;  %v281_v55 = vld [vmem:[%s851_s3 + $0x50] sm:$0xff]  ;;  %v275_v58 = vld [vmem:[%s851_s3 + $0x20] sm:$0xff] }
  0x99   :  { %v779_v56 = vpop.f32.mrf.mxu0 }
  0x9a   :  { %v268_v7 = vmax.f32 %v247_v0, 0.0  ;;  %v217_v38 = vadd.f32 %v779_v56, %v79_v30  ;;  %v274_v56 = vld [vmem:[%s851_s3 + $0x18] sm:$0xff] }
  0x9b   :  { %v278_v0 = vld [vmem:[%s851_s3 + $0x38] sm:$0xff] }
  0x9c   :  { %v258_v45 = vmax.f32 %v217_v38, 0.0 }
  0x9d   :  { %v64_v43 = vpop.permute.xlu0 %63 }
  0x9e   :  { %v208_v47 = vadd.f32 %v773_v50, %v64_v43  ;;  %v272_v50 = vld [vmem:[%s851_s3 + $0x8] sm:$0xff] }
  0x9f   :  { %v249_v59 = vpop.f32.mrf.mxu2 }
  0xa0   :  { %v250_v62 = vadd.f32 %v249_v59, %v134_v61  ;;  %v255_v49 = vmax.f32 %v208_v47, 0.0  ;;  %v283_v59 = vld [vmem:[%s851_s3 + $0x60] sm:$0xff]  ;;  %v284_v61 = vld [vmem:[%s851_s3 + $0x68] sm:$0xff] }
  0xa1   :  { %v219_v60 = vpop.f32.mrf.mxu0 }
  0xa2   :  { %v269_v5 = vmax.f32 %v250_v62, 0.0  ;;  %v220_v35 = vadd.f32 %v219_v60, %v84_v27  ;;  %v276_v60 = vld [vmem:[%s851_s3 + $0x28] sm:$0xff]  ;;  %v277_v62 = vld [vmem:[%s851_s3 + $0x30] sm:$0xff] }
  0xa4   :  { %v259_v42 = vmax.f32 %v220_v35, 0.0 }
  0xa7   :  { %v252_v63 = vpop.f32.mrf.mxu2 }
  0xa8   :  { %v253_v1 = vadd.f32 %v252_v63, %v139_v57  ;;  %v282_v57 = vld [vmem:[%s851_s3 + $0x58] sm:$0xff]  ;;  %v285_v63 = vld [vmem:[%s851_s3 + $0x70] sm:$0xff] }
  0xa9   :  { %v222_v3 = vpop.f32.mrf.mxu0 }
  0xaa   :  { %v270_v6 = vmax.f32 %v253_v1, 0.0  ;;  %v223_v33 = vadd.f32 %v222_v3, %v89_v24  ;;  %v286_v1 = vld [vmem:[%s851_s3 + $0x78] sm:$0xff] }
  0xac   :  { %383 = vmatpush.msra.mxu1 %v270_v6  ;;  %521 = vmatpush.msra.mxu3 %v270_v6  ;;  %v260_v39 = vmax.f32 %v223_v33, 0.0 }
  0xae   :  { %384 = vmatpush.msra.mxu1 %v269_v5  ;;  %522 = vmatpush.msra.mxu3 %v269_v5 }
  0xb0   :  { %385 = vmatpush.msra.mxu1 %v268_v7  ;;  %523 = vmatpush.msra.mxu3 %v268_v7 }
  0xb1   :  { %v225_v11 = vpop.f32.mrf.mxu0 }
  0xb2   :  { %386 = vmatpush.msra.mxu1 %v267_v10  ;;  %524 = vmatpush.msra.mxu3 %v267_v10  ;;  %v226_v31 = vadd.f32 %v225_v11, %v94_v20  ;;  %v381_v11 = vpop.permute.xlu1 %380 }
  0xb4   :  { %387 = vmatpush.msra.mxu1 %v266_v12  ;;  %525 = vmatpush.msra.mxu3 %v266_v12  ;;  %v261_v36 = vmax.f32 %v226_v31, 0.0 }
  0xb9   :  { %v228_v13 = vpop.f32.mrf.mxu0 }
  0xba   :  { %v229_v28 = vadd.f32 %v228_v13, %v99_v19  ;;  %v376_v13 = vpop.permute.xlu2 %375 }
  0xbc   :  { %v262_v34 = vmax.f32 %v229_v28, 0.0 }
  0xc1   :  { %v231_v15 = vpop.f32.mrf.mxu0 }
  0xc2   :  { %v232_v25 = vadd.f32 %v231_v15, %v104_v17  ;;  %v371_v15 = vpop.permute.xlu0 %370  ;;  %v361_v19 = vpop.permute.xlu2 %360 }
  0xc4   :  { %v263_v32 = vmax.f32 %v232_v25, 0.0 }
  0xc9   :  { %v234_v18 = vpop.f32.mrf.mxu0 }
  0xca   :  { %v235_v22 = vadd.f32 %v234_v18, %v109_v16  ;;  %v366_v16 = vpop.permute.xlu1 %365  ;;  %v356_v20 = vpop.permute.xlu0 %355 }
  0xcb   :  { %v346_v28 = vpop.permute.xlu2 %345 }
  0xcc   :  { %v264_v29 = vmax.f32 %v235_v22, 0.0 }
  0xd1   :  { %v237_v21 = vpop.f32.mrf.mxu0 }
  0xd2   :  { %v238_v23 = vadd.f32 %v237_v21, %v114_v14  ;;  %v351_v21 = vpop.permute.xlu1 %350  ;;  %v341_v31 = vpop.permute.xlu0 %340 }
  0xd4   :  { %v265_v26 = vmax.f32 %v238_v23, 0.0 }
  0xd6   :  { %388 = vmatpush.msra.mxu1 %v265_v26  ;;  %526 = vmatpush.msra.mxu3 %v265_v26 }
  0xd8   :  { %389 = vmatpush.msra.mxu1 %v264_v29  ;;  %527 = vmatpush.msra.mxu3 %v264_v29 }
  0xda   :  { %390 = vmatpush.msra.mxu1 %v263_v32  ;;  %528 = vmatpush.msra.mxu3 %v263_v32 }
  0xdc   :  { %391 = vmatpush.msra.mxu1 %v262_v34  ;;  %529 = vmatpush.msra.mxu3 %v262_v34  ;;  %v336_v34 = vpop.permute.xlu1 %335 }
  0xde   :  { %392 = vmatpush.msra.mxu1 %v261_v36  ;;  %530 = vmatpush.msra.mxu3 %v261_v36 }
  0xe0   :  { %393 = vmatpush.msra.mxu1 %v260_v39  ;;  %531 = vmatpush.msra.mxu3 %v260_v39 }
  0xe2   :  { %394 = vmatpush.msra.mxu1 %v259_v42  ;;  %532 = vmatpush.msra.mxu3 %v259_v42  ;;  %v331_v42 = vpop.permute.xlu2 %330 }
  0xe4   :  { %395 = vmatpush.msra.mxu1 %v258_v45  ;;  %533 = vmatpush.msra.mxu3 %v258_v45  ;;  %v326_v45 = vpop.permute.xlu0 %325 }
  0xe6   :  { %396 = vmatpush.msra.mxu1 %v257_v46  ;;  %534 = vmatpush.msra.mxu3 %v257_v46 }
  0xe8   :  { %397 = vmatpush.msra.mxu1 %v256_v48  ;;  %535 = vmatpush.msra.mxu3 %v256_v48  ;;  %v321_v48 = vpop.permute.xlu1 %320 }
  0xea   :  { %398 = vmatpush.msra.mxu1 %v255_v49  ;;  %536 = vmatpush.msra.mxu3 %v255_v49 }
  0xeb   :  { %399 = vmatmul.f32.vlgmr.msra.gmra.mxu1 %v271_v51  ;;  %423 = vmatmul.f32.vlgmr.msra.gmra.mxu3 %v279_v52 }
  0xf3   :  { %402 = vmatmul.f32.gmra.mxu1 %v272_v50  ;;  %426 = vmatmul.f32.gmra.mxu3 %v280_v53 }
  0xfb   :  { %405 = vmatmul.f32.gmra.mxu1 %v273_v54  ;;  %429 = vmatmul.f32.gmra.mxu3 %v281_v55  ;;  %v316_v55 = vpop.permute.xlu2 %315 }
 0x103   :  { %408 = vmatmul.f32.gmra.mxu1 %v274_v56  ;;  %432 = vmatmul.f32.gmra.mxu3 %v282_v57 }
 0x10b   :  { %411 = vmatmul.f32.gmra.mxu1 %v275_v58  ;;  %435 = vmatmul.f32.gmra.mxu3 %v283_v59  ;;  %v311_v58 = vpop.permute.xlu0 %310 }
 0x113   :  { %414 = vmatmul.f32.gmra.mxu1 %v276_v60  ;;  %438 = vmatmul.f32.gmra.mxu3 %v284_v61  ;;  %v306_v61 = vpop.permute.xlu1 %305 }
 0x11b   :  { %417 = vmatmul.f32.gmra.mxu1 %v277_v62  ;;  %441 = vmatmul.f32.gmra.mxu3 %v285_v63 }
 0x123   :  { %420 = vmatmul.f32.gmra.mxu1 %v278_v0  ;;  %444 = vmatmul.f32.gmra.mxu3 %v286_v1 }
 0x168   :  { %v833_v2 = vpop.f32.mrf.mxu1 }
 0x169   :  { %v401_v62 = vadd.f32 %v833_v2, %v306_v61 }
 0x16b   :  { %v448_v1 = vmax.f32 %v401_v62, 0.0 }
 0x16e   :  { %v424_v3 = vpop.f32.mrf.mxu3 }
 0x16f   :  { %v425_v40 = vadd.f32 %v424_v3, %v346_v28  ;;  %v464_v3 = vld [vmem:[%s853_s5] sm:$0x1] }
 0x170   :  { %v835_v4 = vpop.f32.mrf.mxu1 }
 0x171   :  { %v456_v46 = vmax.f32 %v425_v40, 0.0  ;;  %v404_v59 = vadd.f32 %v835_v4, %v311_v58  ;;  %v466_v4 = vstv %s854_s6 }
 0x173   :  { %v449_v0 = vmax.f32 %v404_v59, 0.0 }
 0x176   :  { %v427_v5 = vpop.f32.mrf.mxu3 }
 0x177   :  { %v428_v37 = vadd.f32 %v427_v5, %v351_v21 }
 0x178   :  { %v406_v7 = vpop.f32.mrf.mxu1 }
 0x179   :  { %v457_v43 = vmax.f32 %v428_v37, 0.0  ;;  %v407_v56 = vadd.f32 %v406_v7, %v316_v55 }
 0x17b   :  { %v450_v63 = vmax.f32 %v407_v56, 0.0 }
 0x17e   :  { %v430_v6 = vpop.f32.mrf.mxu3 }
 0x17f   :  { %v431_v35 = vadd.f32 %v430_v6, %v356_v20 }
 0x180   :  { %v409_v9 = vpop.f32.mrf.mxu1 }
 0x181   :  { %v458_v41 = vmax.f32 %v431_v35, 0.0  ;;  %v410_v53 = vadd.f32 %v409_v9, %v321_v48 }
 0x183   :  { %v451_v60 = vmax.f32 %v410_v53, 0.0 }
 0x186   :  { %v433_v8 = vpop.f32.mrf.mxu3 }
 0x187   :  { %v434_v32 = vadd.f32 %v433_v8, %v361_v19 }
 0x188   :  { %v412_v12 = vpop.f32.mrf.mxu1 }
 0x189   :  { %v459_v38 = vmax.f32 %v434_v32, 0.0  ;;  %v413_v52 = vadd.f32 %v412_v12, %v326_v45 }
 0x18b   :  { %v452_v57 = vmax.f32 %v413_v52, 0.0 }
 0x18e   :  { %v436_v10 = vpop.f32.mrf.mxu3 }
 0x18f   :  { %v437_v29 = vadd.f32 %v436_v10, %v366_v16 }
 0x190   :  { %v415_v17 = vpop.f32.mrf.mxu1 }
 0x191   :  { %v460_v36 = vmax.f32 %v437_v29, 0.0  ;;  %v416_v49 = vadd.f32 %v415_v17, %v331_v42 }
 0x193   :  { %v453_v54 = vmax.f32 %v416_v49, 0.0 }
 0x196   :  { %v439_v14 = vpop.f32.mrf.mxu3 }
 0x197   :  { %v440_v26 = vadd.f32 %v439_v14, %v371_v15 }
 0x198   :  { %v418_v25 = vpop.f32.mrf.mxu1 }
 0x199   :  { %v461_v33 = vmax.f32 %v440_v26, 0.0  ;;  %v419_v47 = vadd.f32 %v418_v25, %v336_v34 }
 0x19b   :  { %v454_v50 = vmax.f32 %v419_v47, 0.0 }
 0x19e   :  { %v442_v18 = vpop.f32.mrf.mxu3 }
 0x19f   :  { %v443_v23 = vadd.f32 %v442_v18, %v376_v13 }
 0x1a0   :  { %v421_v39 = vpop.f32.mrf.mxu1 }
 0x1a1   :  { %v462_v30 = vmax.f32 %v443_v23, 0.0  ;;  %v422_v44 = vadd.f32 %v421_v39, %v341_v31 }
 0x1a3   :  { %v455_v51 = vmax.f32 %v422_v44, 0.0 }
 0x1a6   :  { %v445_v22 = vpop.f32.mrf.mxu3 }
 0x1a7   :  { %v446_v24 = vadd.f32 %v445_v22, %v381_v11 }
 0x1a9   :  { %v463_v27 = vmax.f32 %v446_v24, 0.0 }
 0x1ab   :  { %467 = vmatpush.msrb.mxu2 %v463_v27 }
 0x1ad   :  { %468 = vmatpush.msrb.mxu2 %v462_v30 }
 0x1af   :  { %469 = vmatpush.msrb.mxu2 %v461_v33 }
 0x1b1   :  { %470 = vmatpush.msrb.mxu2 %v460_v36 }
 0x1b3   :  { %471 = vmatpush.msrb.mxu2 %v459_v38 }
 0x1b5   :  { %472 = vmatpush.msrb.mxu2 %v458_v41 }
 0x1b7   :  { %473 = vmatpush.msrb.mxu2 %v457_v43 }
 0x1b9   :  { %474 = vmatpush.msrb.mxu2 %v456_v46 }
 0x1bb   :  { %475 = vmatpush.msrb.mxu2 %v455_v51 }
 0x1bd   :  { %476 = vmatpush.msrb.mxu2 %v454_v50 }
 0x1bf   :  { %477 = vmatpush.msrb.mxu2 %v453_v54 }
 0x1c1   :  { %478 = vmatpush.msrb.mxu2 %v452_v57 }
 0x1c3   :  { %479 = vmatpush.msrb.mxu2 %v451_v60 }
 0x1c5   :  { %480 = vmatpush.msrb.mxu2 %v450_v63 }
 0x1c7   :  { %481 = vmatpush.msrb.mxu2 %v449_v0 }
 0x1c9   :  { %482 = vmatpush.msrb.mxu2 %v448_v1 }
 0x1ca   :  { %483 = vmatmul.f32.vlgmr.msrb.gmra.mxu2 %v464_v3 }
 0x24d   :  { %v484_v2 = vpop.f32.mrf.mxu2 }
 0x24e   :  { %v485_v5 = vadd.f32 %v484_v2, %v466_v4 }
 0x250   :  { %487 = vst [vmem:[#allocation3] sm:$0x1] %v485_v5 }
 0x251   :  { %498 = dma.vmem_to_hbm [thread:$0]  %s494_s8, 16, %s496_s0, [#allocation4]  }
 0x252   :  { %566 = dma.done.wait [#allocation4], 16  }
 0x253   :  { %567 = vsyncadd [#allocation4], 4294967280 }
 0x254   :  { %503 = vsyncpa [#allocation4], 1 }

</bundles_post_ra>
